<compile_context>
chip_gen: v6e
topology: v6e:2x2x1
jax: 0.10.0
libtpu: 0.0.40
codegen_flags: <defaults>
</compile_context>

<pallas_src>
import jax
import jax.numpy as jnp
from jax import lax
from jax.experimental import pallas as pl
from jax.experimental.pallas import tpu as pltpu


def _center_loss_kernel(labels_ref,    # SMEM (B,) int32   (scalar prefetch)
                        x_ref,         # VMEM (TB, F)      streamed batch tile
                        centers_ref,   # VMEM (C, F)       resident centers
                        out_ref,       # VMEM (TB, 1)      per-row loss
                        gathered_ref): # VMEM (TB, F)      scratch: centers[labels]
    tile_b, feat = x_ref.shape
    num_class = centers_ref.shape[0]
    total_b = labels_ref.shape[0]
    tile_idx = pl.program_id(0)

    # --- gather centers[labels] for this batch tile (row copies, no MXU) ---
    def gather_row(r, carry):
        # Clamp the global row index so the ragged last tile stays in-bounds,
        # and clamp the label so out-of-range labels cannot read outside the
        # centers block (PyTorch would raise; we clamp and document it).
        row = jnp.minimum(tile_idx * tile_b + r, total_b - 1)
        lab = jnp.clip(labels_ref[row], 0, num_class - 1)
        gathered_ref[pl.ds(r, 1), :] = centers_ref[pl.ds(lab, 1), :]
        return carry

    lax.fori_loop(0, tile_b, gather_row, 0)

    # --- elementwise (x - c)^2, clamp, mean over features (all VPU/XLU) ---
    x = x_ref[...].astype(jnp.float32)          # cast in-kernel (bf16 -> f32)
    c = gathered_ref[...].astype(jnp.float32)
    d = x - c
    dist = jnp.clip(d * d, 1e-12, 1e12)
    out_ref[...] = (jnp.sum(dist, axis=-1, keepdims=True)
                    * (1.0 / feat)).astype(out_ref.dtype)


def _pick_batch_tile(B, F, C, x_itemsize, c_itemsize):
    """Pick a batch tile that fits a conservative per-generation VMEM budget."""
    budget = 24 * 1024 * 1024                 # safe under 32 MiB scoped limit (v5e/v6e/v7x)
    fixed = 2 * C * F * c_itemsize            # resident centers (+ buffer slack)
    per_row = F * (2 * x_itemsize + c_itemsize) + 64   # dbl-buffered x + gather scratch + out
    tb = (budget - fixed) // per_row if budget > fixed else 8
    tb = int(max(8, min(512, tb)))
    if tb >= B:
        return B                              # single tile covering the whole batch
    return max(8, (tb // 8) * 8)              # sublane-aligned tile


def center_loss(x, centers, labels=None, *, tile_b=None):
    """Pallas CenterLoss forward.

    x: (B, F) float (f32/bf16), centers: (C, F) float, labels: (B,) int or None
    (None defaults to zeros, matching the PyTorch module). Returns (B,) loss.
    """
    B, F = x.shape
    C, Fc = centers.shape
    assert F == Fc, "feature dims of x and centers must match"

    if labels is None:
        labels = jnp.zeros((B,), dtype=jnp.int32)
    labels = jnp.asarray(labels, dtype=jnp.int32).reshape(B)

    out_dtype = jnp.promote_types(x.dtype, centers.dtype)
    x_isz = jnp.dtype(x.dtype).itemsize
    c_isz = jnp.dtype(centers.dtype).itemsize

    if tile_b is None:
        tile_b = _pick_batch_tile(B, F, C, x_isz, c_isz)
    tile_b = int(min(tile_b, B))
    if tile_b < B:
        assert tile_b % 8 == 0, "batch tile must be sublane (8) aligned"
    nb = pl.cdiv(B, tile_b)

    grid_spec = pltpu.PrefetchScalarGridSpec(
        num_scalar_prefetch=1,                    # labels -> SMEM, visible to index_maps
        grid=(nb,),
        in_specs=[
            pl.BlockSpec((tile_b, F), lambda i, _lab: (i, 0)),  # x: streamed / double-buffered
            pl.BlockSpec((C, F), lambda i, _lab: (0, 0)),       # centers: resident, DMA'd once
        ],
        out_specs=pl.BlockSpec((tile_b, 1), lambda i, _lab: (i, 0)),
        scratch_shapes=[pltpu.VMEM((tile_b, F), centers.dtype)],
    )

    out = pl.pallas_call(
        _center_loss_kernel,
        out_shape=jax.ShapeDtypeStruct((B, 1), out_dtype),
        grid_spec=grid_spec,
        compiler_params=pltpu.CompilerParams(
            dimension_semantics=("parallel",),          # batch tiles independent (2 TCs on v7x)
            vmem_limit_bytes=32 * 1024 * 1024,          # raise v5e's 16 MiB default
        ),
    )(labels, x, centers)
    return out[:, 0]


if __name__ == "__main__":
    key = jax.random.PRNGKey(0)
    k1, k2, k3, k4, k5, k6 = jax.random.split(key, 6)

    # Case 1: module defaults (num_class=10, num_feature=2), batch=8.
    C1, F1, B1 = 10, 2, 8
    centers1 = jax.random.normal(k1, (C1, F1), dtype=jnp.float32)
    x1 = jax.random.normal(k2, (B1, F1), dtype=jnp.float32)
    labels1 = jax.random.randint(k3, (B1,), 0, C1, dtype=jnp.int32)

    loss1 = jax.block_until_ready(center_loss(x1, centers1, labels1))
    loss1_default = jax.block_until_ready(center_loss(x1, centers1))  # labels=None path

    ref1 = jnp.clip((x1 - centers1[labels1]) ** 2, 1e-12, 1e12).mean(axis=-1)
    ref1_default = jnp.clip((x1 - centers1[0]) ** 2, 1e-12, 1e12).mean(axis=-1)
    assert jnp.allclose(loss1, ref1, rtol=1e-5, atol=1e-6)
    assert jnp.allclose(loss1_default, ref1_default, rtol=1e-5, atol=1e-6)

    # Case 2: lane-dense features, bf16 activations, ragged batch tiling (B=20, TB=8).
    C2, F2, B2 = 32, 256, 20
    centers2 = jax.random.normal(k4, (C2, F2), dtype=jnp.float32)
    x2 = jax.random.normal(k5, (B2, F2), dtype=jnp.float32).astype(jnp.bfloat16)
    labels2 = jax.random.randint(k6, (B2,), 0, C2, dtype=jnp.int32)

    loss2 = jax.block_until_ready(center_loss(x2, centers2, labels2, tile_b=8))
    ref2 = jnp.clip((x2.astype(jnp.float32) - centers2[labels2]) ** 2,
                    1e-12, 1e12).mean(axis=-1)
    assert jnp.allclose(loss2, ref2, rtol=1e-5, atol=1e-6)

    print("KERNEL_OK")
</pallas_src>

<mosaic_0001>
module attributes {stable_mosaic.version = 11 : i64} {
  func.func @_center_loss_kernel(%arg0: i32, %arg1: memref<8xi32, #tpu.memory_space<smem>>, %arg2: memref<8x2xf32, #tpu.memory_space<vmem>>, %arg3: memref<10x2xf32, #tpu.memory_space<vmem>>, %arg4: memref<8x1xf32, #tpu.memory_space<vmem>>, %arg5: memref<8x2xf32, #tpu.memory_space<vmem>>) attributes {dimension_semantics = [#tpu.dimension_semantics<parallel>], iteration_bounds = array<i64: 1>, scalar_prefetch = 1 : i64, scratch_operands = 1 : i64, tpu.core_type = #tpu.core_type<tc>, window_params = [{transform_indices = @transform_0, window_bounds = array<i64: 8, 2>}, {pipeline_mode = #tpu.pipeline_mode<synchronous>, transform_indices = @transform_1, window_bounds = array<i64: 10, 2>}, {transform_indices = @transform_2, window_bounds = array<i64: 8, 1>}]} {
    %c0_i32 = arith.constant 0 : i32
    %c8_i32 = arith.constant 8 : i32
    %0 = arith.addi %c0_i32, %c8_i32 : i32
    %c1_i32 = arith.constant 1 : i32
    scf.for %arg6 = %c0_i32 to %0 step %c1_i32  : i32 {
      %c8_i32_9 = arith.constant 8 : i32
      %14 = arith.muli %arg0, %c8_i32_9 : i32
      %15 = arith.addi %14, %arg6 : i32
      %c7_i32 = arith.constant 7 : i32
      %16 = arith.minsi %15, %c7_i32 : i32
      %17 = arith.index_cast %16 : i32 to index
      %18 = memref.load %arg1[%17] : memref<8xi32, #tpu.memory_space<smem>>
      %c0_i32_10 = arith.constant 0 : i32
      %c9_i32 = arith.constant 9 : i32
      %19 = arith.maxsi %c0_i32_10, %18 : i32
      %20 = arith.minsi %c9_i32, %19 : i32
      %21 = arith.index_cast %20 : i32 to index
      %c0_11 = arith.constant 0 : index
      %22 = vector.load %arg3[%21, %c0_11] : memref<10x2xf32, #tpu.memory_space<vmem>>, vector<1x2xf32>
      %23 = arith.index_cast %arg6 : i32 to index
      %c0_12 = arith.constant 0 : index
      %24 = vector.load %arg5[%23, %c0_12] : memref<8x2xf32, #tpu.memory_space<vmem>>, vector<1x2xf32>
      tpu.vector_store %arg5[%23, %c0_12], %22 {strides = array<i32>} : memref<8x2xf32, #tpu.memory_space<vmem>>, vector<1x2xf32>,
    }
    %c8_i32_0 = arith.constant 8 : i32
    %c0 = arith.constant 0 : index
    %c0_1 = arith.constant 0 : index
    %1 = vector.load %arg2[%c0, %c0_1] : memref<8x2xf32, #tpu.memory_space<vmem>>, vector<8x2xf32>
    %c0_2 = arith.constant 0 : index
    %c0_3 = arith.constant 0 : index
    %2 = vector.load %arg5[%c0_2, %c0_3] : memref<8x2xf32, #tpu.memory_space<vmem>>, vector<8x2xf32>
    %3 = arith.subf %1, %2 : vector<8x2xf32>
    %4 = arith.mulf %3, %3 : vector<8x2xf32>
    %cst = arith.constant 9.99999996E-13 : f32
    %cst_4 = arith.constant 9.99999995E+11 : f32
    %5 = vector.broadcast %cst : f32 to vector<8x2xf32>
    %6 = arith.maximumf %5, %4 : vector<8x2xf32>
    %7 = vector.broadcast %cst_4 : f32 to vector<8x2xf32>
    %8 = arith.minimumf %7, %6 : vector<8x2xf32>
    %cst_5 = arith.constant dense<0.000000e+00> : vector<8xf32>
    %9 = vector.multi_reduction <add>, %8, %cst_5 [1] : vector<8x2xf32> to vector<8xf32>
    %10 = vector.shape_cast %9 : vector<8xf32> to vector<8x1xf32>
    %cst_6 = arith.constant 5.000000e-01 : f32
    %11 = vector.broadcast %cst_6 : f32 to vector<8x1xf32>
    %12 = arith.mulf %10, %11 : vector<8x1xf32>
    %c0_7 = arith.constant 0 : index
    %c0_8 = arith.constant 0 : index
    %13 = vector.load %arg4[%c0_7, %c0_8] : memref<8x1xf32, #tpu.memory_space<vmem>>, vector<8x1xf32>
    tpu.vector_store %arg4[%c0_7, %c0_8], %12 {strides = array<i32>} : memref<8x1xf32, #tpu.memory_space<vmem>>, vector<8x1xf32>,
    return
  }
  func.func @transform_0(%arg0: i32, %arg1: memref<8xi32, #tpu.memory_space<smem>>) -> (i32, i32) {
    %c0_i32 = arith.constant 0 : i32
    %c0_i32_0 = arith.constant 0 : i32
    return %arg0, %c0_i32 : i32, i32
  }
  func.func @transform_1(%arg0: i32, %arg1: memref<8xi32, #tpu.memory_space<smem>>) -> (i32, i32) {
    %c0_i32 = arith.constant 0 : i32
    %c0_i32_0 = arith.constant 0 : i32
    %c0_i32_1 = arith.constant 0 : i32
    return %c0_i32, %c0_i32_0 : i32, i32
  }
  func.func @transform_2(%arg0: i32, %arg1: memref<8xi32, #tpu.memory_space<smem>>) -> (i32, i32) {
    %c0_i32 = arith.constant 0 : i32
    %c0_i32_0 = arith.constant 0 : i32
    return %arg0, %c0_i32 : i32, i32
  }
}

</mosaic_0001>

<bundles_post_ra>
// kernel: tpu_custom_call.1
= control target key start
LH: loop header
LB: loop body
LE: loop exit
PB: predicated region body
PF: predicated region fallthrough
CT: control target
= control target key end

     0   :  { %s133_s0 = inlined_call_operand.vmem [shape: s32[8], index: 0, kind: input, shape index: {}]   ;;  %s134_s1 = inlined_call_operand.vmem [shape: f32[8,2], index: 1, kind: input, shape index: {}]   ;;  %s135_s2 = inlined_call_operand.vmem [shape: f32[10,2], index: 2, kind: input, shape index: {}]   ;;  %s136_s3 = inlined_call_operand.vmem [shape: f32[8,1], index: 3, kind: output, shape index: {}]  }
   0x1   :  { %s8_s14 = sshll.u32 %s133_s0, 4  ;;  %s9_s14 = int_to_ptr.vmem [resolvable:$true] %s8_s14 }
   0x2   :  { %s78_s15 = scalar_lea.vmem %s9_s14, 16  ;;  %p83_p1 = scmp.lt.s32.totalorder %s9_s14, %s9_s14 }
   0x3   :  { %p79_p0 = scmp.ne.s32.totalorder %s9_s14, %s78_s15  ;;  %p84_p2 = scmp.lt.s32.totalorder %s78_s15, %s78_s15 }
   0x5   :  { %p85_p3 = por %p84_p2, %p83_p1 }
   0x7   :  { %p86_p4 = pnand %p85_p3, %p79_p0 }
   0x9   :  { %89 = shalt.err (!%p86_p4)  }
   0xa   :  { %s100_s16 = smov [#allocation4]  }
   0xb   :  { %11 = dma.vmem_to_smem %s9_s14, 16, %s100_s16, [#allocation3] }
   0xc   :  { %94 = dma.done.wait [#allocation3], 16 }
   0xd   :  { %95 = vsyncadd [#allocation3], 4294967280 }
   0xe   :  { %13 = sfence }
   0xf   :  { %s96_s17 = smov 0  }
  0x10 LB: > { %p26_p5 = scmp.lt.s32.totalorder %s98_s17, 7  ;;  %vm36_vm0 = vcmask 8192   ;;  %s35_s22 = scalar_lea.vmem [#allocation2], %s98_s17  ;;  %s98_s17 = sphi %s96_s17, %s23_s17  }
  0x12   : > { %s27_s18 = scalar_select %p26_p5, %s98_s17, 7 }
  0x13   : > { %s23_s17 = sadd.s32 1, %s98_s17  }
  0x14   : > { %s28_s0 = sld [smem:[#allocation4 + %s27_s18]]  ;;  %p20_p8 = scmp.ge.s32.totalorder %s23_s17, 8  }
  0x15   :  { %v38_v1 = vld [vmem:[%s134_s1] sm:$0xff] (%p20_p8)  ;;  %vm44_vm1 = vcmask (%p20_p8), 15360   ;;  %vm49_vm2 = vcmask (%p20_p8), 7168  }
  0x1a   : > { %p29_p6 = scmp.gt.s32.totalorder %s28_s0, 0  ;;  %p62_p7 = scmp.lt.s32.totalorder %s28_s0, 9 }
  0x1c   : > { %s138_s0 = smov (!%p29_p6, %s28_s0), 0  ;;  %22 = sbr.rel (!%p20_p8) target bundleno = 16 (0x10), region = 37 }
  0x1d   : > { %s140_s0 = smov (!%p62_p7, %s138_s0), 9 }
  0x1e   : > { %s33_s21 = scalar_lea.vmem %s135_s2, %s140_s0 }
  0x1f   : > { %v34_v0 = vld [vmem:[%s33_s21] sm:$0x1] }
  0x20   : > { %37 = vst.msk [vmem:[%s35_s22] sm:$0x1] %vm36_vm0, %v34_v0 }
  0x27   :  { %v39_v2 = vld [vmem:[#allocation2] sm:$0xff] }
  0x28   :  { %v40_v3 = vsub.f32 %v38_v1, %v39_v2 }
  0x2a   :  { %v41_v4 = vmul.f32 %v40_v3, %v40_v3 }
  0x2c   :  { %v42_v5 = vmax.f32 %v41_v4, 1e-12 }
  0x2e   :  { %v43_v6 = vmin.f32 %v42_v5, 1e+12 }
  0x30   :  { %v45_v7 = vsel %vm44_vm1, %v43_v6, 0.0 }
  0x31   :  { %46 = vadd.xlane.f32.xlu0 %v45_v7 }
  0xba   :  { %v47_v8 = vpop.xlane.xlu0 %46 }
  0xbb   :  { %v48_v9 = vmul.f32 0.5, %v47_v8 }
  0xbd   :  { %50 = vst.msk [vmem:[%s136_s3] sm:$0xff] %vm49_vm2, %v48_v9 }

</bundles_post_ra>
